<compile_context>
chip_gen: v6e
topology: v6e:2x2x1
jax: 0.10.0
libtpu: 0.0.40
codegen_flags: <defaults>
</compile_context>

<pallas_src>
import jax
import jax.numpy as jnp
from jax.experimental import pallas as pl
from jax.experimental.pallas import tpu as pltpu

BN_EPS = 1e-5
LANE = 128


def _round_up(n, m):
    return ((n + m - 1) // m) * m


# --------------------------------------------------------------------------
# Kernel: 3 matmuls + 2 ReLUs (BN already folded into W/b, dropout = identity)
# --------------------------------------------------------------------------
def mlp_kernel(x_ref, w1_ref, b1_ref, w2_ref, b2_ref, w3_ref, b3_ref, o_ref):
    # fc1 (+ folded bn1) + relu
    h = jnp.dot(x_ref[...], w1_ref[...],
                preferred_element_type=jnp.float32) + b1_ref[...]
    h = jnp.maximum(h, 0.0)
    # fc2 (+ folded bn2) + relu
    h = jnp.dot(h, w2_ref[...],
                preferred_element_type=jnp.float32) + b2_ref[...]
    h = jnp.maximum(h, 0.0)
    # fc3
    o_ref[...] = (jnp.dot(h, w3_ref[...],
                          preferred_element_type=jnp.float32)
                  + b3_ref[...]).astype(o_ref.dtype)


# --------------------------------------------------------------------------
# Wrapper: batch-tiled grid, weights VMEM-resident, lane-dense padded output
# --------------------------------------------------------------------------
def mlp_forward(x, prepped_params, out_features, *, tm=None):
    w1, b1, w2, b2, w3, b3 = prepped_params
    B, D_in = x.shape
    Hp = w1.shape[1]          # padded hidden (multiple of 128)
    Op = w3.shape[1]          # padded output (multiple of 128)

    # Batch tile: full batch for small B, else 256-row tiles (pipelined).
    if tm is None:
        tm = B if B <= 256 else 256
    Bp = _round_up(B, tm)
    if Bp != B:
        x = jnp.pad(x, ((0, Bp - B), (0, 0)))
    grid = (Bp // tm,)

    flops = 2 * Bp * (D_in * Hp + Hp * Hp + Hp * Op)
    bytes_accessed = 4 * (Bp * D_in + w1.size + b1.size + w2.size + b2.size
                          + w3.size + b3.size + Bp * Op)

    out = pl.pallas_call(
        mlp_kernel,
        out_shape=jax.ShapeDtypeStruct((Bp, Op), jnp.float32),
        grid_spec=pltpu.PrefetchScalarGridSpec(
            num_scalar_prefetch=0,
            grid=grid,
            in_specs=[
                pl.BlockSpec((tm, D_in), lambda i: (i, 0)),   # x: tiled over batch
                pl.BlockSpec((D_in, Hp), lambda i: (0, 0)),   # W1': resident
                pl.BlockSpec((1, Hp),   lambda i: (0, 0)),    # b1'
                pl.BlockSpec((Hp, Hp),  lambda i: (0, 0)),    # W2': resident
                pl.BlockSpec((1, Hp),   lambda i: (0, 0)),    # b2'
                pl.BlockSpec((Hp, Op),  lambda i: (0, 0)),    # W3: resident
                pl.BlockSpec((1, Op),   lambda i: (0, 0)),    # b3
            ],
            out_specs=pl.BlockSpec((tm, Op), lambda i: (i, 0)),
        ),
        compiler_params=pltpu.CompilerParams(
            dimension_semantics=("parallel",)),
        cost_estimate=pl.CostEstimate(
            flops=flops, transcendentals=0, bytes_accessed=bytes_accessed),
    )(x, w1, b1, w2, b2, w3, b3)

    return out[:B, :out_features]


# --------------------------------------------------------------------------
# One-time parameter prep: fold eval-mode BN into Linear, pad to lane width.
# --------------------------------------------------------------------------
def fold_and_pad_params(p):
    def fold(w, b, g, be, m, v):
        scale = g * jax.lax.rsqrt(v + BN_EPS)          # (1, H)
        return w * scale, (b - m) * scale + be

    w1, b1 = fold(p["w1"], p["b1"], p["g1"], p["be1"], p["m1"], p["v1"])
    w2, b2 = fold(p["w2"], p["b2"], p["g2"], p["be2"], p["m2"], p["v2"])
    w3, b3 = p["w3"], p["b3"]

    H = w1.shape[1]
    O = w3.shape[1]
    ph = _round_up(H, LANE) - H
    po = _round_up(O, LANE) - O

    w1p = jnp.pad(w1, ((0, 0), (0, ph)))
    b1p = jnp.pad(b1, ((0, 0), (0, ph)))
    w2p = jnp.pad(w2, ((0, ph), (0, ph)))
    b2p = jnp.pad(b2, ((0, 0), (0, ph)))
    w3p = jnp.pad(w3, ((0, ph), (0, po)))
    b3p = jnp.pad(b3, ((0, 0), (0, po)))
    return tuple(jax.device_put(a) for a in (w1p, b1p, w2p, b2p, w3p, b3p))


# --------------------------------------------------------------------------
# Deterministic PyTorch-style init. Linear weights stored as (in, out).
# --------------------------------------------------------------------------
def init_params(key, input_size, hidden_size, output_size):
    def linear(k, fan_in, fan_out):
        k_w, k_b = jax.random.split(k)
        bound = 1.0 / jnp.sqrt(fan_in)
        w = jax.random.uniform(k_w, (fan_in, fan_out), jnp.float32, -bound, bound)
        b = jax.random.uniform(k_b, (1, fan_out), jnp.float32, -bound, bound)
        return w, b

    k1, k2, k3 = jax.random.split(key, 3)
    w1, b1 = linear(k1, input_size, hidden_size)
    w2, b2 = linear(k2, hidden_size, hidden_size)
    w3, b3 = linear(k3, hidden_size, output_size)

    ones_h = jnp.ones((1, hidden_size), jnp.float32)
    zeros_h = jnp.zeros((1, hidden_size), jnp.float32)
    return dict(
        w1=w1, b1=b1, g1=ones_h, be1=zeros_h, m1=zeros_h, v1=ones_h,
        w2=w2, b2=b2, g2=ones_h, be2=zeros_h, m2=zeros_h, v2=ones_h,
        w3=w3, b3=b3,
    )


def mlp_reference(x, p):
    """Pure-JAX reference (unfolded, unpadded) for correctness checking."""
    h = x @ p["w1"] + p["b1"]
    h = (h - p["m1"]) / jnp.sqrt(p["v1"] + BN_EPS) * p["g1"] + p["be1"]
    h = jnp.maximum(h, 0.0)
    h = h @ p["w2"] + p["b2"]
    h = (h - p["m2"]) / jnp.sqrt(p["v2"] + BN_EPS) * p["g2"] + p["be2"]
    h = jnp.maximum(h, 0.0)
    return h @ p["w3"] + p["b3"]


if __name__ == "__main__":
    # Small shapes consistent with the MLP: batch=8, input=64, hidden=32, output=10.
    B, INPUT_SIZE, HIDDEN_SIZE, OUTPUT_SIZE = 8, 64, 32, 10

    key = jax.random.PRNGKey(0)
    k_x, k_p = jax.random.split(key)
    x = jax.random.normal(k_x, (B, INPUT_SIZE), jnp.float32)

    raw_params = init_params(k_p, INPUT_SIZE, HIDDEN_SIZE, OUTPUT_SIZE)
    prepped = fold_and_pad_params(raw_params)   # one-time host-side fold + pad

    out = mlp_forward(x, prepped, OUTPUT_SIZE)
    out = jax.block_until_ready(out)

    ref = mlp_reference(x, raw_params)
    assert out.shape == (B, OUTPUT_SIZE)
    assert jnp.allclose(out, ref, atol=1e-4, rtol=1e-4), "mismatch vs reference"

    print("KERNEL_OK")
</pallas_src>

<mosaic_0001>
module attributes {stable_mosaic.version = 11 : i64} {
  func.func @mlp_kernel(%arg0: i32, %arg1: memref<8x64xf32, #tpu.memory_space<vmem>>, %arg2: memref<64x128xf32, #tpu.memory_space<vmem>>, %arg3: memref<1x128xf32, #tpu.memory_space<vmem>>, %arg4: memref<128x128xf32, #tpu.memory_space<vmem>>, %arg5: memref<1x128xf32, #tpu.memory_space<vmem>>, %arg6: memref<128x128xf32, #tpu.memory_space<vmem>>, %arg7: memref<1x128xf32, #tpu.memory_space<vmem>>, %arg8: memref<8x128xf32, #tpu.memory_space<vmem>>) attributes {dimension_semantics = [#tpu.dimension_semantics<parallel>], iteration_bounds = array<i64: 1>, scalar_prefetch = 0 : i64, scratch_operands = 0 : i64, tpu.core_type = #tpu.core_type<tc>, window_params = [{transform_indices = @transform_0, window_bounds = array<i64: 8, 64>}, {pipeline_mode = #tpu.pipeline_mode<synchronous>, transform_indices = @transform_1, window_bounds = array<i64: 64, 128>}, {pipeline_mode = #tpu.pipeline_mode<synchronous>, transform_indices = @transform_2, window_bounds = array<i64: 1, 128>}, {pipeline_mode = #tpu.pipeline_mode<synchronous>, transform_indices = @transform_3, window_bounds = array<i64: 128, 128>}, {pipeline_mode = #tpu.pipeline_mode<synchronous>, transform_indices = @transform_4, window_bounds = array<i64: 1, 128>}, {pipeline_mode = #tpu.pipeline_mode<synchronous>, transform_indices = @transform_5, window_bounds = array<i64: 128, 128>}, {pipeline_mode = #tpu.pipeline_mode<synchronous>, transform_indices = @transform_6, window_bounds = array<i64: 1, 128>}, {transform_indices = @transform_7, window_bounds = array<i64: 8, 128>}]} {
    %c0 = arith.constant 0 : index
    %c0_0 = arith.constant 0 : index
    %0 = vector.load %arg1[%c0, %c0_0] : memref<8x64xf32, #tpu.memory_space<vmem>>, vector<8x64xf32>
    %c0_1 = arith.constant 0 : index
    %c0_2 = arith.constant 0 : index
    %1 = vector.load %arg2[%c0_1, %c0_2] : memref<64x128xf32, #tpu.memory_space<vmem>>, vector<64x128xf32>
    %cst = arith.constant dense<0.000000e+00> : vector<8x128xf32>
    %2 = tpu.matmul %0, %1, %cst {dimension_numbers = #tpu.dot_dimension_numbers<[1], [0], [0], [1], [0, 0, 1, 1], [], []>} : vector<8x64xf32>, vector<64x128xf32>, vector<8x128xf32> -> vector<8x128xf32>
    %c0_3 = arith.constant 0 : index
    %c0_4 = arith.constant 0 : index
    %3 = vector.load %arg3[%c0_3, %c0_4] : memref<1x128xf32, #tpu.memory_space<vmem>>, vector<1x128xf32>
    %4 = vector.broadcast %3 : vector<1x128xf32> to vector<8x128xf32>
    %5 = arith.addf %2, %4 : vector<8x128xf32>
    %cst_5 = arith.constant 0.000000e+00 : f32
    %6 = vector.broadcast %cst_5 : f32 to vector<8x128xf32>
    %7 = arith.maximumf %5, %6 : vector<8x128xf32>
    %c0_6 = arith.constant 0 : index
    %c0_7 = arith.constant 0 : index
    %8 = vector.load %arg4[%c0_6, %c0_7] : memref<128x128xf32, #tpu.memory_space<vmem>>, vector<128x128xf32>
    %cst_8 = arith.constant dense<0.000000e+00> : vector<8x128xf32>
    %9 = tpu.matmul %7, %8, %cst_8 {dimension_numbers = #tpu.dot_dimension_numbers<[1], [0], [0], [1], [0, 0, 1, 1], [], []>} : vector<8x128xf32>, vector<128x128xf32>, vector<8x128xf32> -> vector<8x128xf32>
    %c0_9 = arith.constant 0 : index
    %c0_10 = arith.constant 0 : index
    %10 = vector.load %arg5[%c0_9, %c0_10] : memref<1x128xf32, #tpu.memory_space<vmem>>, vector<1x128xf32>
    %11 = vector.broadcast %10 : vector<1x128xf32> to vector<8x128xf32>
    %12 = arith.addf %9, %11 : vector<8x128xf32>
    %cst_11 = arith.constant 0.000000e+00 : f32
    %13 = vector.broadcast %cst_11 : f32 to vector<8x128xf32>
    %14 = arith.maximumf %12, %13 : vector<8x128xf32>
    %c0_12 = arith.constant 0 : index
    %c0_13 = arith.constant 0 : index
    %15 = vector.load %arg6[%c0_12, %c0_13] : memref<128x128xf32, #tpu.memory_space<vmem>>, vector<128x128xf32>
    %cst_14 = arith.constant dense<0.000000e+00> : vector<8x128xf32>
    %16 = tpu.matmul %14, %15, %cst_14 {dimension_numbers = #tpu.dot_dimension_numbers<[1], [0], [0], [1], [0, 0, 1, 1], [], []>} : vector<8x128xf32>, vector<128x128xf32>, vector<8x128xf32> -> vector<8x128xf32>
    %c0_15 = arith.constant 0 : index
    %c0_16 = arith.constant 0 : index
    %17 = vector.load %arg7[%c0_15, %c0_16] : memref<1x128xf32, #tpu.memory_space<vmem>>, vector<1x128xf32>
    %18 = vector.broadcast %17 : vector<1x128xf32> to vector<8x128xf32>
    %19 = arith.addf %16, %18 : vector<8x128xf32>
    %c0_17 = arith.constant 0 : index
    %c0_18 = arith.constant 0 : index
    %20 = vector.load %arg8[%c0_17, %c0_18] : memref<8x128xf32, #tpu.memory_space<vmem>>, vector<8x128xf32>
    tpu.vector_store %arg8[%c0_17, %c0_18], %19 {strides = array<i32>} : memref<8x128xf32, #tpu.memory_space<vmem>>, vector<8x128xf32>,
    return
  }
  func.func @transform_0(%arg0: i32) -> (i32, i32) {
    %c0_i32 = arith.constant 0 : i32
    %c0_i32_0 = arith.constant 0 : i32
    return %arg0, %c0_i32 : i32, i32
  }
  func.func @transform_1(%arg0: i32) -> (i32, i32) {
    %c0_i32 = arith.constant 0 : i32
    %c0_i32_0 = arith.constant 0 : i32
    %c0_i32_1 = arith.constant 0 : i32
    return %c0_i32, %c0_i32_0 : i32, i32
  }
  func.func @transform_2(%arg0: i32) -> (i32, i32) {
    %c0_i32 = arith.constant 0 : i32
    %c0_i32_0 = arith.constant 0 : i32
    %c0_i32_1 = arith.constant 0 : i32
    return %c0_i32, %c0_i32_0 : i32, i32
  }
  func.func @transform_3(%arg0: i32) -> (i32, i32) {
    %c0_i32 = arith.constant 0 : i32
    %c0_i32_0 = arith.constant 0 : i32
    %c0_i32_1 = arith.constant 0 : i32
    return %c0_i32, %c0_i32_0 : i32, i32
  }
  func.func @transform_4(%arg0: i32) -> (i32, i32) {
    %c0_i32 = arith.constant 0 : i32
    %c0_i32_0 = arith.constant 0 : i32
    %c0_i32_1 = arith.constant 0 : i32
    return %c0_i32, %c0_i32_0 : i32, i32
  }
  func.func @transform_5(%arg0: i32) -> (i32, i32) {
    %c0_i32 = arith.constant 0 : i32
    %c0_i32_0 = arith.constant 0 : i32
    %c0_i32_1 = arith.constant 0 : i32
    return %c0_i32, %c0_i32_0 : i32, i32
  }
  func.func @transform_6(%arg0: i32) -> (i32, i32) {
    %c0_i32 = arith.constant 0 : i32
    %c0_i32_0 = arith.constant 0 : i32
    %c0_i32_1 = arith.constant 0 : i32
    return %c0_i32, %c0_i32_0 : i32, i32
  }
  func.func @transform_7(%arg0: i32) -> (i32, i32) {
    %c0_i32 = arith.constant 0 : i32
    %c0_i32_0 = arith.constant 0 : i32
    return %arg0, %c0_i32 : i32, i32
  }
}

</mosaic_0001>

<bundles_post_ra>
// kernel: tpu_custom_call.1
= control target key start
LH: loop header
LB: loop body
LE: loop exit
PB: predicated region body
PF: predicated region fallthrough
CT: control target
= control target key end

     0   :  { %12 = vsyncpa [#allocation3], 0  ;;  %s757_s0 = inlined_call_operand.hbm [shape: f32[8,64], index: 0, kind: input, shape index: {}]   ;;  %s758_s1 = inlined_call_operand.hbm [shape: f32[64,128], index: 1, kind: input, shape index: {}]   ;;  %s759_s2 = inlined_call_operand.vmem [shape: f32[1,128], index: 2, kind: input, shape index: {}]   ;;  %s760_s3 = inlined_call_operand.hbm [shape: f32[128,128], index: 3, kind: input, shape index: {}]   ;;  %s761_s4 = inlined_call_operand.vmem [shape: f32[1,128], index: 4, kind: input, shape index: {}]   ;;  %s762_s5 = inlined_call_operand.hbm [shape: f32[128,128], index: 5, kind: input, shape index: {}]   ;;  %s763_s6 = inlined_call_operand.vmem [shape: f32[1,128], index: 6, kind: input, shape index: {}]   ;;  %s764_s7 = inlined_call_operand.hbm [shape: f32[8,128], index: 7, kind: output, shape index: {}]  }
   0x1   :  { %13 = vsyncpa [#allocation6], 0 }
   0x2   :  { %14 = vsyncpa [#allocation9], 0 }
   0x3   :  { %15 = vsyncpa [#allocation4], 0  ;;  %s629_s24 = smov [#allocation5]  }
   0x4   :  { %s31_s25 = sshll.u32 %s629_s24, 4  ;;  %s32_s25 = int_to_ptr.vmem [resolvable:$true] %s31_s25 }
   0x5   :  { %s529_s26 = scalar_lea.vmem %s32_s25, 1024  ;;  %p534_p1 = scmp.lt.s32.totalorder %s32_s25, %s32_s25 }
   0x6   :  { %p530_p0 = scmp.ne.s32.totalorder %s32_s25, %s529_s26  ;;  %p535_p2 = scmp.lt.s32.totalorder %s529_s26, %s529_s26 }
   0x8   :  { %p536_p3 = por %p535_p2, %p534_p1 }
   0xa   :  { %p537_p4 = pnand %p536_p3, %p530_p0 }
   0xc   :  { %540 = shalt.err (!%p537_p4)
}
   0xd   :  { %s630_s27 = smov 128   ;;  %s631_s28 = smov 8  }
   0xe   :  { %37 = dma.hbm_to_vmem [thread:$0]  %s758_s1, 1024, %s32_s25, [#allocation6], %s630_s27, %s630_s27, %s631_s28  }
   0xf   :  { %s632_s8 = smov [#allocation2]   ;;  %s633_s10 = smov [#allocation7]  }
  0x10   :  { %s22_s9 = sshll.u32 %s632_s8, 4  ;;  %s45_s11 = sshll.u32 %s633_s10, 4  ;;  %s23_s9 = int_to_ptr.vmem [resolvable:$true] %s22_s9  ;;  %s46_s11 = int_to_ptr.vmem [resolvable:$true] %s45_s11 }
  0x11   :  { %s549_s12 = scalar_lea.vmem %s23_s9, 128  ;;  %p554_p6 = scmp.lt.s32.totalorder %s23_s9, %s23_s9 }
  0x12   :  { %p550_p5 = scmp.ne.s32.totalorder %s23_s9, %s549_s12  ;;  %p555_p7 = scmp.lt.s32.totalorder %s549_s12, %s549_s12 }
  0x14   :  { %p556_p8 = por %p555_p7, %p554_p6 }
  0x16   :  { %p557_p9 = pnand %p556_p8, %p550_p5 }
  0x18   :  { %560 = shalt.err (!%p557_p9)
}
  0x19   :  { %25 = dma.hbm_to_vmem [thread:$0]  %s757_s0, 128, %s23_s9, [#allocation3]  }
  0x1a   :  { %s569_s15 = scalar_lea.vmem %s46_s11, 2048  ;;  %p574_p11 = scmp.lt.s32.totalorder %s46_s11, %s46_s11 }
  0x1b   :  { %p570_p10 = scmp.ne.s32.totalorder %s46_s11, %s569_s15  ;;  %p575_p12 = scmp.lt.s32.totalorder %s569_s15, %s569_s15 }
  0x1d   :  { %p576_p13 = por %p575_p12, %p574_p11 }
  0x1f   :  { %p577_p0 = pnand %p576_p13, %p570_p10 }
  0x21   :  { %580 = shalt.err (!%p577_p0)
}
  0x22   :  { %51 = dma.hbm_to_vmem [thread:$0]  %s760_s3, 2048, %s46_s11, [#allocation6], %s630_s27, %s630_s27, %s631_s28  }
  0x23   :  { %s634_s17 = smov [#allocation8]  }
  0x24   :  { %s59_s18 = sshll.u32 %s634_s17, 4  ;;  %s60_s18 = int_to_ptr.vmem [resolvable:$true] %s59_s18 }
  0x25   :  { %s589_s19 = scalar_lea.vmem %s60_s18, 2048  ;;  %p594_p2 = scmp.lt.s32.totalorder %s60_s18, %s60_s18 }
  0x26   :  { %p590_p1 = scmp.ne.s32.totalorder %s60_s18, %s589_s19  ;;  %p595_p3 = scmp.lt.s32.totalorder %s589_s19, %s589_s19 }
  0x28   :  { %p596_p4 = por %p595_p3, %p594_p2 }
  0x2a   :  { %p597_p5 = pnand %p596_p4, %p590_p1 }
  0x2c   :  { %600 = shalt.err (!%p597_p5)
}
  0x2d   :  { %65 = dma.hbm_to_vmem [thread:$0]  %s762_s5, 2048, %s60_s18, [#allocation9], %s630_s27, %s630_s27, %s631_s28  }
  0x2e   :  { %621 = dma.done.wait [#allocation3], 128  }
  0x2f   :  { %622 = vsyncadd [#allocation3], 4294967168 }
  0x30   :  { %623 = dma.done.wait [#allocation6], 3072  }
  0x31   :  { %624 = vsyncadd [#allocation6], 4294964224 }
  0x32   :  { %625 = dma.done.wait [#allocation9], 2048  }
  0x33   :  { %626 = vsyncadd [#allocation9], 4294965248  ;;  %v635_v0 = vmov 0.0   ;;  %vm636_vm0 = vmmov 0   ;;  %v88_v1 = vld [vmem:[#allocation5 + $0x38] sm:$0xff]  ;;  %v87_v2 = vld [vmem:[#allocation5 + $0x30] sm:$0xff] }
  0x34   :  { %423 = vmatprep.subr.mxu0 %v635_v0  ;;  %439 = vmatprep.mubr.msk.f32.mxu0 %vm636_vm0, %v635_v0  ;;  %v86_v3 = vld [vmem:[#allocation5 + $0x28] sm:$0xff]  ;;  %v186_v4 = vld [vmem:[#allocation7 + $0x78] sm:$0xff]  ;;  %v185_v5 = vld [vmem:[#allocation7 + $0x70] sm:$0xff]  ;;  %vm96_vm1 = vcmask 523264   ;;  %s637_s24 = smov [#allocation10]  }
  0x35   :  { %442 = vmatprep.subr.mxu1 %v635_v0  ;;  %474 = vmatprep.mubr.msk.f32.mxu1 %vm636_vm0, %v635_v0  ;;  %v85_v6 = vld [vmem:[#allocation5 + $0x20] sm:$0xff]  ;;  %v184_v7 = vld [vmem:[#allocation7 + $0x68] sm:$0xff]  ;;  %v84_v8 = vld [vmem:[#allocation5 + $0x18] sm:$0xff]  ;;  %s365_s25 = sshll.u32 %s637_s24, 4  ;;  %s366_s25 = int_to_ptr.vmem [resolvable:$true] %s365_s25 }
  0x36   :  { %424 = vmatpush3.msra.mxu0 %v88_v1  ;;  %443 = vmatpush3.msra.mxu1 %v186_v4  ;;  %v183_v9 = vld [vmem:[#allocation7 + $0x60] sm:$0xff]  ;;  %v83_v10 = vld [vmem:[#allocation5 + $0x10] sm:$0xff]  ;;  %v182_v11 = vld [vmem:[#allocation7 + $0x58] sm:$0xff]  ;;  %s601_s26 = scalar_lea.vmem %s366_s25, 128  ;;  %p606_p7 = scmp.lt.s32.totalorder %s366_s25, %s366_s25 }
  0x37   :  { %425 = vmatprep.subr.mxu0 %v635_v0  ;;  %444 = vmatprep.subr.mxu1 %v635_v0  ;;  %v82_v12 = vld [vmem:[#allocation5 + $0x8] sm:$0xff]  ;;  %v181_v13 = vld [vmem:[#allocation7 + $0x50] sm:$0xff]  ;;  %v81_v14 = vld [vmem:[#allocation5] sm:$0xff]  ;;  %p602_p6 = scmp.ne.s32.totalorder %s366_s25, %s601_s26  ;;  %p607_p8 = scmp.lt.s32.totalorder %s601_s26, %s601_s26 }
  0x38   :  { %426 = vmatpush3.msra.mxu0 %v87_v2  ;;  %445 = vmatpush3.msra.mxu1 %v185_v5  ;;  %v80_v15 = vld [vmem:[#allocation2] sm:$0xff]  ;;  %v180_v16 = vld [vmem:[#allocation7 + $0x48] sm:$0xff]  ;;  %v179_v17 = vld [vmem:[#allocation7 + $0x40] sm:$0xff] }
  0x39   :  { %427 = vmatprep.subr.mxu0 %v635_v0  ;;  %446 = vmatprep.subr.mxu1 %v635_v0  ;;  %v178_v18 = vld [vmem:[#allocation7 + $0x38] sm:$0xff]  ;;  %v177_v19 = vld [vmem:[#allocation7 + $0x30] sm:$0xff]  ;;  %v176_v20 = vld [vmem:[#allocation7 + $0x28] sm:$0xff]  ;;  %p608_p9 = por %p607_p8, %p606_p7 }
  0x3a   :  { %428 = vmatpush3.msra.mxu0 %v86_v3  ;;  %447 = vmatpush3.msra.mxu1 %v184_v7  ;;  %v175_v21 = vld [vmem:[#allocation7 + $0x20] sm:$0xff]  ;;  %v174_v22 = vld [vmem:[#allocation7 + $0x18] sm:$0xff]  ;;  %v173_v23 = vld [vmem:[#allocation7 + $0x10] sm:$0xff] }
  0x3b   :  { %429 = vmatprep.subr.mxu0 %v635_v0  ;;  %448 = vmatprep.subr.mxu1 %v635_v0  ;;  %v172_v24 = vld [vmem:[#allocation7 + $0x8] sm:$0xff]  ;;  %v171_v25 = vld [vmem:[#allocation7] sm:$0xff]  ;;  %v280_v26 = vld [vmem:[#allocation8 + $0x78] sm:$0xff]  ;;  %p609_p10 = pnand %p608_p9, %p602_p6 }
  0x3c   :  { %430 = vmatpush3.msra.mxu0 %v85_v6  ;;  %449 = vmatpush3.msra.mxu1 %v183_v9  ;;  %v279_v27 = vld [vmem:[#allocation8 + $0x70] sm:$0xff]  ;;  %v278_v28 = vld [vmem:[#allocation8 + $0x68] sm:$0xff]  ;;  %v277_v29 = vld [vmem:[#allocation8 + $0x60] sm:$0xff] }
  0x3d   :  { %431 = vmatprep.subr.mxu0 %v635_v0  ;;  %450 = vmatprep.subr.mxu1 %v635_v0  ;;  %v276_v30 = vld [vmem:[#allocation8 + $0x58] sm:$0xff]  ;;  %v275_v31 = vld [vmem:[#allocation8 + $0x50] sm:$0xff]  ;;  %v274_v32 = vld [vmem:[#allocation8 + $0x48] sm:$0xff] }
  0x3e   :  { %432 = vmatpush3.msra.mxu0 %v84_v8  ;;  %451 = vmatpush3.msra.mxu1 %v182_v11  ;;  %v273_v33 = vld [vmem:[#allocation8 + $0x40] sm:$0xff]  ;;  %v272_v34 = vld [vmem:[#allocation8 + $0x38] sm:$0xff]  ;;  %v271_v35 = vld [vmem:[#allocation8 + $0x30] sm:$0xff] }
  0x3f   :  { %433 = vmatprep.subr.mxu0 %v635_v0  ;;  %452 = vmatprep.subr.mxu1 %v635_v0  ;;  %v270_v36 = vld [vmem:[#allocation8 + $0x28] sm:$0xff]  ;;  %v269_v37 = vld [vmem:[#allocation8 + $0x20] sm:$0xff]  ;;  %v268_v38 = vld [vmem:[#allocation8 + $0x18] sm:$0xff] }
  0x40   :  { %434 = vmatpush3.msra.mxu0 %v83_v10  ;;  %453 = vmatpush3.msra.mxu1 %v181_v13  ;;  %v376_v39 = vld [vmem:[%s759_s2] ss:$0 sm:$0xff]  ;;  %v267_v44 = vld [vmem:[#allocation8 + $0x10] sm:$0xff]  ;;  %v266_v45 = vld [vmem:[#allocation8 + $0x8] sm:$0xff] }
  0x41   :  { %435 = vmatprep.subr.mxu0 %v635_v0  ;;  %454 = vmatprep.subr.mxu1 %v635_v0  ;;  %v265_v46 = vld [vmem:[#allocation8] sm:$0xff]  ;;  %v378_v47 = vld [vmem:[%s761_s4] ss:$0 sm:$0xff] }
  0x42   :  { %436 = vmatpush3.msra.mxu0 %v82_v12  ;;  %455 = vmatpush3.msra.mxu1 %v180_v16  ;;  %v379_v52 = vld [vmem:[%s763_s6] ss:$0 sm:$0xff] }
  0x43   :  { %437 = vmatprep.subr.mxu0 %v635_v0  ;;  %456 = vmatprep.subr.mxu1 %v635_v0 }
  0x44   :  { %438 = vmatpush3.msra.mxu0 %v81_v14  ;;  %457 = vmatpush3.msra.mxu1 %v179_v17 }
  0x45   :  { %440 = vmatmul.mubr.msk.f32.vlgmr.msra.gmra.mxu0 %vm96_vm1, %v80_v15  ;;  %477 = vmatprep.subr.mxu0 %v635_v0 }
  0x46   :  { %509 = vmatprep.mubr.msk.f32.mxu0 %vm636_vm0, %v635_v0  ;;  %458 = vmatprep.subr.mxu1 %v635_v0 }
  0x47   :  { %459 = vmatpush3.msra.mxu1 %v178_v18  ;;  %478 = vmatpush3.msra.mxu0 %v280_v26 }
  0x48   :  { %460 = vmatprep.subr.mxu1 %v635_v0  ;;  %479 = vmatprep.subr.mxu0 %v635_v0 }
  0x49   :  { %461 = vmatpush3.msra.mxu1 %v177_v19  ;;  %480 = vmatpush3.msra.mxu0 %v279_v27 }
  0x4a   :  { %462 = vmatprep.subr.mxu1 %v635_v0  ;;  %481 = vmatprep.subr.mxu0 %v635_v0 }
  0x4b   :  { %463 = vmatpush3.msra.mxu1 %v176_v20  ;;  %482 = vmatpush3.msra.mxu0 %v278_v28 }
  0x4c   :  { %464 = vmatprep.subr.mxu1 %v635_v0  ;;  %483 = vmatprep.subr.mxu0 %v635_v0 }
  0x4d   :  { %465 = vmatpush3.msra.mxu1 %v175_v21  ;;  %484 = vmatpush3.msra.mxu0 %v277_v29 }
  0x4e   :  { %466 = vmatprep.subr.mxu1 %v635_v0  ;;  %485 = vmatprep.subr.mxu0 %v635_v0 }
  0x4f   :  { %467 = vmatpush3.msra.mxu1 %v174_v22  ;;  %486 = vmatpush3.msra.mxu0 %v276_v30 }
  0x50   :  { %468 = vmatprep.subr.mxu1 %v635_v0  ;;  %487 = vmatprep.subr.mxu0 %v635_v0 }
  0x51   :  { %469 = vmatpush3.msra.mxu1 %v173_v23  ;;  %488 = vmatpush3.msra.mxu0 %v275_v31 }
  0x52   :  { %470 = vmatprep.subr.mxu1 %v635_v0  ;;  %489 = vmatprep.subr.mxu0 %v635_v0 }
  0x53   :  { %471 = vmatpush3.msra.mxu1 %v172_v24  ;;  %490 = vmatpush3.msra.mxu0 %v274_v32 }
  0x54   :  { %472 = vmatprep.subr.mxu1 %v635_v0  ;;  %491 = vmatprep.subr.mxu0 %v635_v0 }
  0x55   :  { %473 = vmatpush3.msra.mxu1 %v171_v25  ;;  %492 = vmatpush3.msra.mxu0 %v273_v33 }
  0x56   :  { %493 = vmatprep.subr.mxu0 %v635_v0 }
  0x57   :  { %494 = vmatpush3.msra.mxu0 %v272_v34 }
  0x58   :  { %495 = vmatprep.subr.mxu0 %v635_v0 }
  0x59   :  { %496 = vmatpush3.msra.mxu0 %v271_v35 }
  0x5a   :  { %497 = vmatprep.subr.mxu0 %v635_v0 }
  0x5b   :  { %498 = vmatpush3.msra.mxu0 %v270_v36 }
  0x5c   :  { %499 = vmatprep.subr.mxu0 %v635_v0 }
  0x5d   :  { %500 = vmatpush3.msra.mxu0 %v269_v37 }
  0x5e   :  { %501 = vmatprep.subr.mxu0 %v635_v0 }
  0x5f   :  { %502 = vmatpush3.msra.mxu0 %v268_v38 }
  0x60   :  { %503 = vmatprep.subr.mxu0 %v635_v0 }
  0x61   :  { %504 = vmatpush3.msra.mxu0 %v267_v44 }
  0x62   :  { %505 = vmatprep.subr.mxu0 %v635_v0 }
  0x63   :  { %506 = vmatpush3.msra.mxu0 %v266_v45 }
  0x64   :  { %507 = vmatprep.subr.mxu0 %v635_v0 }
  0x65   :  { %508 = vmatpush3.msra.mxu0 %v265_v46 }
 0x105   :  { %v166_v40 = vpop.f32.mrf.mxu0 }
 0x106   :  { %v167_v41 = vadd.f32 %v376_v39, %v166_v40 }
 0x107   :  { %v441_v42 = vpop.f32.mrf.mxu0 }
 0x108   :  { %v170_v43 = vmax.f32 %v167_v41, 0.0 }
 0x10a   :  { %475 = vmatmul.mubr.f32.vlgmr.msra.gmra.mxu1 %v170_v43 }
 0x1ca   :  { %v260_v48 = vpop.f32.mrf.mxu1 }
 0x1cb   :  { %v261_v49 = vadd.f32 %v378_v47, %v260_v48 }
 0x1cc   :  { %v476_v50 = vpop.f32.mrf.mxu1 }
 0x1cd   :  { %v264_v51 = vmax.f32 %v261_v49, 0.0 }
 0x1cf   :  { %510 = vmatmul.mubr.f32.vlgmr.msra.gmra.mxu0 %v264_v51 }
 0x28f   :  { %v354_v53 = vpop.f32.mrf.mxu0 }
 0x290   :  { %v355_v54 = vadd.f32 %v379_v52, %v354_v53 }
 0x291   :  { %v511_v55 = vpop.f32.mrf.mxu0 }
 0x292   :  { %358 = vst [vmem:[#allocation10] sm:$0xff] %v355_v54 }
 0x293   :  { %612 = shalt.err (!%p609_p10)
}
 0x294   :  { %368 = dma.vmem_to_hbm [thread:$0]  %s366_s25, 128, %s764_s7, [#allocation4]  }
 0x295   :  { %627 = dma.done.wait [#allocation4], 128  }
 0x296   :  { %628 = vsyncadd [#allocation4], 4294967168 }
 0x297   :  { %372 = vsyncpa [#allocation3], 1 }
 0x298   :  { %373 = vsyncpa [#allocation6], 1 }
 0x299   :  { %374 = vsyncpa [#allocation9], 1 }
 0x29a   :  { %375 = vsyncpa [#allocation4], 1 }

</bundles_post_ra>
